<compile_context>
chip_gen: v7x
topology: tpu7x:2x2x1
jax: 0.10.0
libtpu: 0.0.40
codegen_flags: <defaults>
</compile_context>

<pallas_src>
import functools

import jax
import jax.numpy as jnp
from jax.experimental import pallas as pl
from jax.experimental.pallas import tpu as pltpu

NEG_SLOPE = 0.2  # both GATConv attention leaky-relu and encoder's nn.LeakyReLU(0.2)
BN_EPS = 1e-5


def _leaky_relu(v, slope=NEG_SLOPE):
    return jnp.where(v >= 0, v, slope * v)


# ----------------------------------------------------------------------------
# Pallas kernels
# ----------------------------------------------------------------------------
def gat_project_kernel(x_ref, w_ref, asrc_ref, adst_ref, h_ref, ssrc_ref, sdst_ref):
    """Per-node projection + per-head attention scores for one row tile."""
    h = jnp.dot(x_ref[...], w_ref[...], preferred_element_type=jnp.float32)   # (TM, HD)
    h_ref[...] = h
    # Block-diagonal score matrices give all per-head scores with one tiny MXU matmul each.
    ssrc_ref[...] = jnp.dot(h, asrc_ref[...], preferred_element_type=jnp.float32)  # (TM, heads)
    sdst_ref[...] = jnp.dot(h, adst_ref[...], preferred_element_type=jnp.float32)  # (TM, heads)


def gat_attention_kernel(h_ref, ssrct_ref, sdst_ref, mask_ref, bias_ref, hmask_ref,
                         out_ref, *, heads):
    """Masked softmax attention + aggregation for one destination-row tile."""
    h = h_ref[...]                                        # (N, HD)   resident
    ssrc_t = ssrct_ref[...]                               # (heads, N) resident
    sdst = sdst_ref[...]                                  # (TM, heads)
    neg = mask_ref[...].astype(jnp.float32)               # (TM, N)  additive edge mask
    hmask = hmask_ref[...]                                # (heads, HD)

    acc = jnp.zeros(out_ref.shape, jnp.float32)           # (TM, HD)
    for hd in range(heads):
        # e[i, j] = leaky_relu(a_dst[i] + a_src[j]) + mask
        e = _leaky_relu(sdst[:, hd:hd + 1] + ssrc_t[hd:hd + 1, :]) + neg       # (TM, N)
        m = jnp.max(e, axis=-1, keepdims=True)
        p = jnp.exp(e - m)                                                     # 0 on non-edges
        denom = jnp.sum(p, axis=-1, keepdims=True)                             # (TM, 1)
        # Aggregate first, normalize after: reciprocal only touches (TM, 1).
        agg = jnp.dot(p, h * hmask[hd], preferred_element_type=jnp.float32)    # (TM, HD)
        acc = acc + agg * pl.reciprocal(denom, approx=True)
    # GATConv bias + encoder LeakyReLU, single lane-dense store of the full tile.
    out_ref[...] = _leaky_relu(acc + bias_ref[...])


def head_kernel(pool_ref, x_ref, cond_ref, scale_p_ref, shift_p_ref,
                scale_c_ref, shift_c_ref, wp_ref, wc_ref, b_ref, out_ref, acc_ref):
    """global_add_pool (tiled over N) -> concat(cond) -> BatchNorm1d(eval) -> Linear."""
    k = pl.program_id(0)

    @pl.when(k == 0)
    def _():
        acc_ref[...] = jnp.zeros_like(acc_ref)

    acc_ref[...] += jnp.dot(pool_ref[...], x_ref[...], preferred_element_type=jnp.float32)

    @pl.when(k == pl.num_programs(0) - 1)
    def _():
        yp = acc_ref[...] * scale_p_ref[...] + shift_p_ref[...]
        yc = cond_ref[...] * scale_c_ref[...] + shift_c_ref[...]
        out = jnp.dot(yp, wp_ref[...], preferred_element_type=jnp.float32)
        out = out + jnp.dot(yc, wc_ref[...], preferred_element_type=jnp.float32)
        out_ref[...] = out + b_ref[...]


# ----------------------------------------------------------------------------
# Wrappers
# ----------------------------------------------------------------------------
def gat_project(x, w, a_src, a_dst, *, heads, tm):
    n, fin = x.shape
    hd_tot = w.shape[1]
    n_tiles = n // tm
    return pl.pallas_call(
        gat_project_kernel,
        out_shape=(jax.ShapeDtypeStruct((n, hd_tot), jnp.float32),
                   jax.ShapeDtypeStruct((n, heads), jnp.float32),
                   jax.ShapeDtypeStruct((n, heads), jnp.float32)),
        grid=(n_tiles,),
        in_specs=[
            pl.BlockSpec((tm, fin), lambda i: (i, 0)),        # x rows of this tile
            pl.BlockSpec((fin, hd_tot), lambda i: (0, 0)),    # W
            pl.BlockSpec((hd_tot, heads), lambda i: (0, 0)),  # A_src (block-diagonal)
            pl.BlockSpec((hd_tot, heads), lambda i: (0, 0)),  # A_dst (block-diagonal)
        ],
        out_specs=(pl.BlockSpec((tm, hd_tot), lambda i: (i, 0)),
                   pl.BlockSpec((tm, heads), lambda i: (i, 0)),
                   pl.BlockSpec((tm, heads), lambda i: (i, 0))),
        compiler_params=pltpu.CompilerParams(dimension_semantics=("parallel",)),
    )(x, w, a_src, a_dst)


def gat_attention(h, ssrc_t, sdst, mask_b, bias, head_mask, *, heads, tm):
    n, hd_tot = h.shape
    n_tiles = n // tm
    kernel = functools.partial(gat_attention_kernel, heads=heads)
    return pl.pallas_call(
        kernel,
        out_shape=jax.ShapeDtypeStruct((n, hd_tot), jnp.float32),
        grid=(n_tiles,),
        in_specs=[
            pl.BlockSpec((n, hd_tot), lambda i: (0, 0)),      # h: all source rows (resident)
            pl.BlockSpec((heads, n), lambda i: (0, 0)),       # s_src^T (resident)
            pl.BlockSpec((tm, heads), lambda i: (i, 0)),      # s_dst rows of this tile
            pl.BlockSpec((tm, n), lambda i: (i, 0)),          # additive mask rows (bf16)
            pl.BlockSpec((1, hd_tot), lambda i: (0, 0)),      # GATConv bias
            pl.BlockSpec((heads, hd_tot), lambda i: (0, 0)),  # head column masks
        ],
        out_specs=pl.BlockSpec((tm, hd_tot), lambda i: (i, 0)),
        compiler_params=pltpu.CompilerParams(dimension_semantics=("parallel",)),
    )(h, ssrc_t, sdst, mask_b, bias, head_mask)


def encoder_head(x, pool, cond, scale_p, shift_p, scale_c, shift_c, wp, wc, b, *, tm):
    bsz, n = pool.shape
    hd_tot = x.shape[1]
    latent = wp.shape[1]
    ncond = cond.shape[1]
    n_tiles = n // tm
    return pl.pallas_call(
        head_kernel,
        out_shape=jax.ShapeDtypeStruct((bsz, latent), jnp.float32),
        grid=(n_tiles,),
        in_specs=[
            pl.BlockSpec((bsz, tm), lambda k: (0, k)),
            pl.BlockSpec((tm, hd_tot), lambda k: (k, 0)),
            pl.BlockSpec((bsz, ncond), lambda k: (0, 0)),
            pl.BlockSpec((1, hd_tot), lambda k: (0, 0)),
            pl.BlockSpec((1, hd_tot), lambda k: (0, 0)),
            pl.BlockSpec((1, ncond), lambda k: (0, 0)),
            pl.BlockSpec((1, ncond), lambda k: (0, 0)),
            pl.BlockSpec((hd_tot, latent), lambda k: (0, 0)),
            pl.BlockSpec((ncond, latent), lambda k: (0, 0)),
            pl.BlockSpec((1, latent), lambda k: (0, 0)),
        ],
        out_specs=pl.BlockSpec((bsz, latent), lambda k: (0, 0)),
        scratch_shapes=[pltpu.VMEM((bsz, hd_tot), jnp.float32)],
        compiler_params=pltpu.CompilerParams(dimension_semantics=("arbitrary",)),
    )(pool, x, cond, scale_p, shift_p, scale_c, shift_c, wp, wc, b)


def _score_mats(att_src, att_dst, heads, head_dim):
    """Block-diagonal (HD, heads) matrices so h @ A gives all per-head scores at once."""
    eye = jnp.eye(heads, dtype=jnp.float32)
    a_src = (att_src[:, :, None] * eye[:, None, :]).reshape(heads * head_dim, heads)
    a_dst = (att_dst[:, :, None] * eye[:, None, :]).reshape(heads * head_dim, heads)
    return a_src, a_dst


def _pad_graph(x, adj, pool):
    """Pad N to a tiling-friendly size (mult of 8 for small graphs, 256 otherwise)."""
    n = x.shape[0]
    mult = 8 if n <= 256 else 256
    pad = (-n) % mult
    if pad == 0:
        return x, adj, pool
    n_p = n + pad
    x_p = jnp.zeros((n_p, x.shape[1]), x.dtype).at[:n].set(x)
    adj_p = jnp.zeros((n_p, n_p), adj.dtype).at[:n, :n].set(adj)
    idx = jnp.arange(n, n_p)
    adj_p = adj_p.at[idx, idx].set(1.0)  # self loops on padded rows keep softmax finite
    pool_p = jnp.zeros((pool.shape[0], n_p), pool.dtype).at[:, :n].set(pool)
    return x_p, adj_p, pool_p


def gat_encoder_forward(x, adj, pool, cond, params, *, heads, hidden_dim):
    x, adj, pool = _pad_graph(x, adj, pool)
    n = x.shape[0]
    tm = n if n <= 256 else 256                 # v7x-safe tile (O(TM*N) VMEM per step)
    # Additive edge mask precomputed once for all layers (bf16 halves adjacency HBM traffic).
    mask_b = jnp.where(adj > 0, 0.0, -1e30).astype(jnp.bfloat16)
    head_mask = jnp.repeat(jnp.eye(heads, dtype=jnp.float32), hidden_dim, axis=1)
    for layer in params["layers"]:
        a_src_m, a_dst_m = _score_mats(layer["att_src"], layer["att_dst"], heads, hidden_dim)
        h, s_src, s_dst = gat_project(x, layer["w"], a_src_m, a_dst_m, heads=heads, tm=tm)
        # Tiny (N, heads) -> (heads, N) transpose so the attention kernel broadcasts the
        # source scores along lanes without any in-kernel XLU transpose.
        x = gat_attention(h, s_src.T, s_dst, mask_b, layer["bias"], head_mask,
                          heads=heads, tm=tm)
    return encoder_head(x, pool, cond,
                        params["bn_scale_p"], params["bn_shift_p"],
                        params["bn_scale_c"], params["bn_shift_c"],
                        params["fc_w_p"], params["fc_w_c"], params["fc_b"], tm=tm)


# ----------------------------------------------------------------------------
# Pure-JAX reference (same dense math) for correctness check
# ----------------------------------------------------------------------------
def reference_forward(x, adj, pool, cond, params, *, heads, hidden_dim):
    for layer in params["layers"]:
        h = x @ layer["w"]
        outs = []
        for hd in range(heads):
            hh = h[:, hd * hidden_dim:(hd + 1) * hidden_dim]
            a_src = jnp.sum(hh * layer["att_src"][hd], axis=-1, keepdims=True)
            a_dst = jnp.sum(hh * layer["att_dst"][hd], axis=-1, keepdims=True)
            e = _leaky_relu(a_dst + a_src.T)
            e = jnp.where(adj > 0, e, -1e30)
            p = jnp.exp(e - jnp.max(e, axis=-1, keepdims=True))
            p = jnp.where(adj > 0, p, 0.0)
            attn = p / jnp.sum(p, axis=-1, keepdims=True)
            outs.append(attn @ hh + layer["bias"][0, hd * hidden_dim:(hd + 1) * hidden_dim])
        x = _leaky_relu(jnp.concatenate(outs, axis=-1))
    pooled = pool @ x
    yp = pooled * params["bn_scale_p"] + params["bn_shift_p"]
    yc = cond * params["bn_scale_c"] + params["bn_shift_c"]
    return yp @ params["fc_w_p"] + yc @ params["fc_w_c"] + params["fc_b"]


# ----------------------------------------------------------------------------
# Deterministic parameter init (shapes follow GATEncoder.__init__)
# ----------------------------------------------------------------------------
def init_params(key, input_dim, hidden_dim, latent_dim, n_layers, n_condition, heads):
    d_out = hidden_dim * heads
    d_bn = d_out + n_condition
    keys = jax.random.split(key, 4 * n_layers + 6)
    ki = iter(range(len(keys)))

    layers = []
    in_dim = input_dim
    for _ in range(n_layers):
        layers.append({
            "w": 0.2 * jax.random.normal(keys[next(ki)], (in_dim, d_out), jnp.float32),
            "att_src": 0.2 * jax.random.normal(keys[next(ki)], (heads, hidden_dim), jnp.float32),
            "att_dst": 0.2 * jax.random.normal(keys[next(ki)], (heads, hidden_dim), jnp.float32),
            "bias": 0.1 * jax.random.normal(keys[next(ki)], (1, d_out), jnp.float32),
        })
        in_dim = d_out

    # BatchNorm1d(d_bn) in eval mode, folded into scale/shift.
    gamma = 1.0 + 0.1 * jax.random.normal(keys[next(ki)], (d_bn,), jnp.float32)
    beta = 0.1 * jax.random.normal(keys[next(ki)], (d_bn,), jnp.float32)
    run_mean = 0.1 * jax.random.normal(keys[next(ki)], (d_bn,), jnp.float32)
    run_var = 0.5 + jnp.abs(jax.random.normal(keys[next(ki)], (d_bn,), jnp.float32))
    scale = gamma / jnp.sqrt(run_var + BN_EPS)
    shift = beta - run_mean * scale

    # Linear(d_bn, latent_dim), stored as (in, out); split into pooled / cond segments.
    fc_w = 0.2 * jax.random.normal(keys[next(ki)], (d_bn, latent_dim), jnp.float32)
    fc_b = 0.1 * jax.random.normal(keys[next(ki)], (1, latent_dim), jnp.float32)

    return {
        "layers": layers,
        "bn_scale_p": scale[:d_out].reshape(1, d_out),
        "bn_shift_p": shift[:d_out].reshape(1, d_out),
        "bn_scale_c": scale[d_out:].reshape(1, n_condition),
        "bn_shift_c": shift[d_out:].reshape(1, n_condition),
        "fc_w_p": fc_w[:d_out],
        "fc_w_c": fc_w[d_out:],
        "fc_b": fc_b,
    }


def build_graph(n_nodes_per_graph, n_graphs):
    """Ring graph (both directions) inside each graph + self loops; no cross-graph edges."""
    N = n_nodes_per_graph * n_graphs
    adj = jnp.zeros((N, N), jnp.float32)
    for g in range(n_graphs):
        base = g * n_nodes_per_graph
        for k in range(n_nodes_per_graph):
            i = base + k
            j = base + (k + 1) % n_nodes_per_graph
            adj = adj.at[j, i].set(1.0)   # edge i -> j
            adj = adj.at[i, j].set(1.0)   # edge j -> i
            adj = adj.at[i, i].set(1.0)   # self loop (GATConv add_self_loops=True)
    batch = jnp.repeat(jnp.arange(n_graphs), n_nodes_per_graph)
    pool = (batch[None, :] == jnp.arange(n_graphs)[:, None]).astype(jnp.float32)  # (B, N)
    return adj, pool


if __name__ == "__main__":
    input_dim, hidden_dim, latent_dim = 8, 8, 16
    n_layers, n_condition, heads = 2, 4, 4
    nodes_per_graph, n_graphs = 8, 2
    N = nodes_per_graph * n_graphs

    key = jax.random.PRNGKey(0)
    k_x, k_c, k_p = jax.random.split(key, 3)

    x = jax.random.normal(k_x, (N, input_dim), jnp.float32)              # data.x
    cond = jax.random.normal(k_c, (n_graphs, n_condition), jnp.float32)  # data.stats reshaped
    adj, pool = build_graph(nodes_per_graph, n_graphs)
    params = init_params(k_p, input_dim, hidden_dim, latent_dim, n_layers, n_condition, heads)

    out = gat_encoder_forward(x, adj, pool, cond, params, heads=heads, hidden_dim=hidden_dim)
    out = jax.block_until_ready(out)

    ref = reference_forward(x, adj, pool, cond, params, heads=heads, hidden_dim=hidden_dim)
    assert out.shape == (n_graphs, latent_dim)
    # Slightly relaxed tolerance: kernel uses the EUP approximate reciprocal for the
    # softmax normalization; the reference uses an exact divide.
    assert jnp.allclose(out, ref, rtol=5e-3, atol=5e-3), "mismatch vs. JAX reference"

    print("KERNEL_OK")
</pallas_src>

<mosaic_0001>
module attributes {stable_mosaic.version = 11 : i64} {
  func.func @gat_project_kernel(%arg0: i32, %arg1: memref<16x8xf32, #tpu.memory_space<vmem>>, %arg2: memref<8x32xf32, #tpu.memory_space<vmem>>, %arg3: memref<32x4xf32, #tpu.memory_space<vmem>>, %arg4: memref<32x4xf32, #tpu.memory_space<vmem>>, %arg5: memref<16x32xf32, #tpu.memory_space<vmem>>, %arg6: memref<16x4xf32, #tpu.memory_space<vmem>>, %arg7: memref<16x4xf32, #tpu.memory_space<vmem>>) attributes {dimension_semantics = [#tpu.dimension_semantics<parallel>], iteration_bounds = array<i64: 1>, scalar_prefetch = 0 : i64, scratch_operands = 0 : i64, tpu.core_type = #tpu.core_type<tc>, window_params = [{transform_indices = @transform_0, window_bounds = array<i64: 16, 8>}, {pipeline_mode = #tpu.pipeline_mode<synchronous>, transform_indices = @transform_1, window_bounds = array<i64: 8, 32>}, {pipeline_mode = #tpu.pipeline_mode<synchronous>, transform_indices = @transform_2, window_bounds = array<i64: 32, 4>}, {pipeline_mode = #tpu.pipeline_mode<synchronous>, transform_indices = @transform_3, window_bounds = array<i64: 32, 4>}, {transform_indices = @transform_4, window_bounds = array<i64: 16, 32>}, {transform_indices = @transform_5, window_bounds = array<i64: 16, 4>}, {transform_indices = @transform_6, window_bounds = array<i64: 16, 4>}]} {
    %c0 = arith.constant 0 : index
    %c0_0 = arith.constant 0 : index
    %0 = vector.load %arg1[%c0, %c0_0] : memref<16x8xf32, #tpu.memory_space<vmem>>, vector<16x8xf32>
    %c0_1 = arith.constant 0 : index
    %c0_2 = arith.constant 0 : index
    %1 = vector.load %arg2[%c0_1, %c0_2] : memref<8x32xf32, #tpu.memory_space<vmem>>, vector<8x32xf32>
    %cst = arith.constant dense<0.000000e+00> : vector<16x32xf32>
    %2 = tpu.matmul %0, %1, %cst {dimension_numbers = #tpu.dot_dimension_numbers<[1], [0], [0], [1], [0, 0, 1, 1], [], []>} : vector<16x8xf32>, vector<8x32xf32>, vector<16x32xf32> -> vector<16x32xf32>
    %c0_3 = arith.constant 0 : index
    %c0_4 = arith.constant 0 : index
    %3 = vector.load %arg5[%c0_3, %c0_4] : memref<16x32xf32, #tpu.memory_space<vmem>>, vector<16x32xf32>
    tpu.vector_store %arg5[%c0_3, %c0_4], %2 {strides = array<i32>} : memref<16x32xf32, #tpu.memory_space<vmem>>, vector<16x32xf32>,
    %c0_5 = arith.constant 0 : index
    %c0_6 = arith.constant 0 : index
    %4 = vector.load %arg3[%c0_5, %c0_6] : memref<32x4xf32, #tpu.memory_space<vmem>>, vector<32x4xf32>
    %cst_7 = arith.constant dense<0.000000e+00> : vector<16x4xf32>
    %5 = tpu.matmul %2, %4, %cst_7 {dimension_numbers = #tpu.dot_dimension_numbers<[1], [0], [0], [1], [0, 0, 1, 1], [], []>} : vector<16x32xf32>, vector<32x4xf32>, vector<16x4xf32> -> vector<16x4xf32>
    %c0_8 = arith.constant 0 : index
    %c0_9 = arith.constant 0 : index
    %6 = vector.load %arg6[%c0_8, %c0_9] : memref<16x4xf32, #tpu.memory_space<vmem>>, vector<16x4xf32>
    tpu.vector_store %arg6[%c0_8, %c0_9], %5 {strides = array<i32>} : memref<16x4xf32, #tpu.memory_space<vmem>>, vector<16x4xf32>,
    %c0_10 = arith.constant 0 : index
    %c0_11 = arith.constant 0 : index
    %7 = vector.load %arg4[%c0_10, %c0_11] : memref<32x4xf32, #tpu.memory_space<vmem>>, vector<32x4xf32>
    %cst_12 = arith.constant dense<0.000000e+00> : vector<16x4xf32>
    %8 = tpu.matmul %2, %7, %cst_12 {dimension_numbers = #tpu.dot_dimension_numbers<[1], [0], [0], [1], [0, 0, 1, 1], [], []>} : vector<16x32xf32>, vector<32x4xf32>, vector<16x4xf32> -> vector<16x4xf32>
    %c0_13 = arith.constant 0 : index
    %c0_14 = arith.constant 0 : index
    %9 = vector.load %arg7[%c0_13, %c0_14] : memref<16x4xf32, #tpu.memory_space<vmem>>, vector<16x4xf32>
    tpu.vector_store %arg7[%c0_13, %c0_14], %8 {strides = array<i32>} : memref<16x4xf32, #tpu.memory_space<vmem>>, vector<16x4xf32>,
    return
  }
  func.func @transform_0(%arg0: i32) -> (i32, i32) {
    %c0_i32 = arith.constant 0 : i32
    %c0_i32_0 = arith.constant 0 : i32
    return %arg0, %c0_i32 : i32, i32
  }
  func.func @transform_1(%arg0: i32) -> (i32, i32) {
    %c0_i32 = arith.constant 0 : i32
    %c0_i32_0 = arith.constant 0 : i32
    %c0_i32_1 = arith.constant 0 : i32
    return %c0_i32, %c0_i32_0 : i32, i32
  }
  func.func @transform_2(%arg0: i32) -> (i32, i32) {
    %c0_i32 = arith.constant 0 : i32
    %c0_i32_0 = arith.constant 0 : i32
    %c0_i32_1 = arith.constant 0 : i32
    return %c0_i32, %c0_i32_0 : i32, i32
  }
  func.func @transform_3(%arg0: i32) -> (i32, i32) {
    %c0_i32 = arith.constant 0 : i32
    %c0_i32_0 = arith.constant 0 : i32
    %c0_i32_1 = arith.constant 0 : i32
    return %c0_i32, %c0_i32_0 : i32, i32
  }
  func.func @transform_4(%arg0: i32) -> (i32, i32) {
    %c0_i32 = arith.constant 0 : i32
    %c0_i32_0 = arith.constant 0 : i32
    return %arg0, %c0_i32 : i32, i32
  }
  func.func @transform_5(%arg0: i32) -> (i32, i32) {
    %c0_i32 = arith.constant 0 : i32
    %c0_i32_0 = arith.constant 0 : i32
    return %arg0, %c0_i32 : i32, i32
  }
  func.func @transform_6(%arg0: i32) -> (i32, i32) {
    %c0_i32 = arith.constant 0 : i32
    %c0_i32_0 = arith.constant 0 : i32
    return %arg0, %c0_i32 : i32, i32
  }
}

</mosaic_0001>

<bundles_post_ra>
// kernel: tpu_custom_call.1
= control target key start
LH: loop header
LB: loop body
LE: loop exit
PB: predicated region body
PF: predicated region fallthrough
CT: control target
= control target key end

     0   :  { %vm24_vm0 = vcmask 64512   ;;  %s488_s0 = inlined_call_operand.vmem [shape: f32[16,8], index: 0, kind: input, shape index: {}]   ;;  %s489_s1 = inlined_call_operand.vmem [shape: f32[8,32], index: 1, kind: input, shape index: {}]   ;;  %s490_s2 = inlined_call_operand.vmem [shape: f32[32,4], index: 2, kind: input, shape index: {}]   ;;  %s491_s3 = inlined_call_operand.vmem [shape: f32[32,4], index: 3, kind: input, shape index: {}]   ;;  %s492_s4 = inlined_call_operand.hbm [shape: f32[16,32], index: 4, kind: output, shape index: {0}]   ;;  %s493_s5 = inlined_call_operand.vmem [shape: f32[16,4], index: 5, kind: output, shape index: {1}]   ;;  %s494_s6 = inlined_call_operand.vmem [shape: f32[16,4], index: 6, kind: output, shape index: {2}]  }
   0x1   :  { %v23_v0 = vld [vmem:[%s489_s1] sm:$0xff]  ;;  %v22_v2 = vld [vmem:[%s488_s0 + $0x8] sm:$0xff]  ;;  %v111_v8 = vld [vmem:[%s490_s2 + $0x10] sm:$0xff] }
   0x2   :  { %v21_v1 = vld [vmem:[%s488_s0] sm:$0xff]  ;;  %323 = vmatprep.subr.mxu0 %v23_v0  ;;  %v110_v4 = vld [vmem:[%s490_s2 + $0x8] sm:$0xff]  ;;  %v112_v9 = vld [vmem:[%s490_s2 + $0x18] sm:$0xff] }
   0x3   :  { %325 = vmatprep.mubr.msk.f32.mxu0 %vm24_vm0, %v21_v1  ;;  %v109_v3 = vld [vmem:[%s490_s2] sm:$0xff]  ;;  %324 = vmatpush3.msra.mxu0 %v23_v0  ;;  %v198_v7 = vld [vmem:[%s491_s3 + $0x8] sm:$0xff]  ;;  %v354_v11 = vpack.c.bf16 %v112_v9, %v111_v8  ;;  %v199_v12 = vld [vmem:[%s491_s3 + $0x10] sm:$0xff] }
   0x4   :  { %v197_v5 = vld [vmem:[%s491_s3] sm:$0xff]  ;;  %v350_v6 = vpack.c.bf16 %v110_v4, %v109_v3  ;;  %326 = vmatmul.mubr.msk.f32.vlgmr.msra.gmra.mrb[0].mxu0 %vm24_vm0, %v22_v2  ;;  %v200_v13 = vld [vmem:[%s491_s3 + $0x18] sm:$0xff] }
   0x5   :  { %v358_v10 = vpack.c.bf16 %v198_v7, %v197_v5 }
   0x6   :  { %12 = vsyncpa [#allocation3], 0  ;;  %351 = vmatprep.subr.bf16.mxu1 %v350_v6  ;;  %v362_v14 = vpack.c.bf16 %v200_v13, %v199_v12  ;;  %vm106_vm1 = vcmask 261120   ;;  %s393_s2 = smov [#allocation2]  }
   0x7   :  { %359 = vmatprep.subr.bf16.mxu0 %v358_v10  ;;  %353 = vmatpush3.bf16.msra.mxu1 %v350_v6  ;;  %s283_s3 = sshll.u32 %s393_s2, 4  ;;  %s284_s3 = int_to_ptr.vmem [resolvable:$true] %s283_s3 }
   0x8   :  { %361 = vmatpush3.bf16.msra.mxu0 %v358_v10  ;;  %355 = vmatprep.subr.bf16.mxu1 %v354_v11  ;;  %s369_s17 = scalar_lea.vmem %s284_s3, 256  ;;  %p374_p1 = scmp.lt.s32.totalorder %s284_s3, %s284_s3 }
   0x9   :  { %363 = vmatprep.subr.bf16.mxu0 %v362_v14  ;;  %p370_p0 = scmp.ne.s32.totalorder %s284_s3, %s369_s17  ;;  %p375_p2 = scmp.lt.s32.totalorder %s369_s17, %s369_s17 }
   0xb   :  { %357 = vmatpush3.bf16.msra.mxu1 %v354_v11  ;;  %p376_p3 = por %p375_p2, %p374_p1 }
   0xc   :  { %365 = vmatpush3.bf16.msra.mxu0 %v362_v14 }
   0xd   :  { %p377_p4 = pnand %p376_p3, %p370_p0 }
  0xd7   :  { %v327_v15 = vpop.f32.mrb[0].mxu0 }
  0xd8   :  { %108 = vst.msk [vmem:[#allocation2 + $0x8] sm:$0xff] %vm106_vm1, %v327_v15  ;;  %v97_v16 = vpop.f32.mrb[1].mxu0 }
  0xd9   :  { %107 = vst.msk [vmem:[#allocation2] sm:$0xff] %vm106_vm1, %v97_v16  ;;  %336 = vmatprep.mubr.msk.f32.mxu1 %vm106_vm1, %v97_v16  ;;  %347 = vmatprep.mubr.msk.f32.mxu0 %vm106_vm1, %v97_v16 }
  0xda   :  { %337 = vmatmul.mubr.msk.f32.vlgmr.msra.gmra.mrb[0].mxu1 %vm106_vm1, %v327_v15  ;;  %348 = vmatmul.mubr.msk.f32.vlgmr.msra.gmra.mrb[2].mxu0 %vm106_vm1, %v327_v15 }
  0xdb   :  { %380 = shalt.err (!%p377_p4)
}
  0xdc   :  { %s381_s20 = scalar_lea.hbm %s492_s4, 256 }
  0xdd   :  { %p382_p5 = scmp.ne.s32.totalorder %s492_s4, %s381_s20  ;;  %p385_p6 = scmp.lt.u32.totalorder %s381_s20, %s492_s4 }
  0xdf   :  { %p387_p7 = pnand %p385_p6, %p382_p5 }
  0xe1   :  { %390 = shalt.err (!%p387_p7)
}
  0xe2   :  { %s394_s25 = smov 128   ;;  %s395_s26 = smov 8   ;;  %vm194_vm2 = vcmask 31744  }
  0xe3   :  { %289 = dma.vmem_to_hbm [thread:$0]  %s284_s3, 256, %s492_s4, [#allocation3], %s394_s25, %s394_s25, %s395_s26  }
 0x1ad   :  { %v338_v17 = vpop.f32.mrb[0].mxu1  ;;  %v349_v18 = vpop.f32.mrb[2].mxu0 }
 0x1ae   :  { %196 = vst.msk [vmem:[%s493_s5 + $0x8] sm:$0xff] %vm194_vm2, %v338_v17  ;;  %277 = vst.msk [vmem:[%s494_s6 + $0x8] sm:$0xff] %vm194_vm2, %v349_v18  ;;  %v185_v19 = vpop.f32.mrb[1].mxu1  ;;  %v267_v20 = vpop.f32.mrb[3].mxu0 }
 0x1af   :  { %195 = vst.msk [vmem:[%s493_s5] sm:$0xff] %vm194_vm2, %v185_v19  ;;  %276 = vst.msk [vmem:[%s494_s6] sm:$0xff] %vm194_vm2, %v267_v20 }
 0x1b0   :  { %391 = dma.done.wait [#allocation3], 256  }
 0x1b1   :  { %392 = vsyncadd [#allocation3], 4294967040 }
 0x1b2   :  { %301 = vsyncpa [#allocation3], 1 }

</bundles_post_ra>
